<compile_context>
chip_gen: v7x
topology: tpu7x:2x2x1
jax: 0.10.0
libtpu: 0.0.40
codegen_flags: <defaults>
</compile_context>

<pallas_src>
import jax
import jax.numpy as jnp
from jax import lax
from jax.experimental import pallas as pl
from jax.experimental.pallas import tpu as pltpu


def _conv3x3_relu_kernel(x_ref, xh0_ref, xh1_ref, w_ref, b_ref, o_ref, patch_ref):
    # x_ref    : (1, th, W+2, Cin)  padded rows [j*th, j*th+th) of the image
    # xh0_ref  : (1, 1,  W+2, Cin)  padded row  j*th+th      (halo row 0)
    # xh1_ref  : (1, 1,  W+2, Cin)  padded row  j*th+th+1    (halo row 1)
    # w_ref    : (9*Cin, Cout)      3x3 taps flattened as (kh, kw, cin) row-major
    # b_ref    : (1, Cout)          f32 bias
    # o_ref    : (1, th, W, Cout)   output block
    # patch_ref: (th, W, 9*Cin)     VMEM im2col scratch (built once per step)
    th = x_ref.shape[1]
    w = x_ref.shape[2] - 2
    cin = x_ref.shape[3]
    cout = w_ref.shape[1]

    # im2col directly from the row block: output row r, tap kh reads padded
    # local row r + kh.  Rows 0..th-1 live in x_ref; rows th, th+1 are the halo.
    for kh in range(3):
        rows = th - kh
        for kw in range(3):
            c0 = (kh * 3 + kw) * cin
            if rows > 0:
                patch_ref[0:rows, :, c0:c0 + cin] = x_ref[0, kh:kh + rows, kw:kw + w, :]

    # Halo contributions (2 rows only).
    for kw in range(3):
        h0 = xh0_ref[0, 0, kw:kw + w, :]   # padded local row th
        h1 = xh1_ref[0, 0, kw:kw + w, :]   # padded local row th + 1
        # kh = 1: output row th-1 reads padded row th
        patch_ref[th - 1, :, (3 + kw) * cin:(4 + kw) * cin] = h0
        # kh = 2: output row th-2 reads padded row th, output row th-1 reads th+1
        if th >= 2:
            patch_ref[th - 2, :, (6 + kw) * cin:(7 + kw) * cin] = h0
        patch_ref[th - 1, :, (6 + kw) * cin:(7 + kw) * cin] = h1

    # Single fused MXU matmul with f32 accumulation; bias + ReLU in the epilogue.
    p2 = patch_ref[...].reshape(th * w, 9 * cin)
    acc = jnp.dot(p2, w_ref[...], preferred_element_type=jnp.float32)
    acc = acc.reshape(th, w, cout) + b_ref[...]
    o_ref[0] = jnp.maximum(acc, 0.0).astype(o_ref.dtype)


def _pick_row_tile(H, B, block_h):
    """Largest divisor of H that is <= block_h; shrink when B==1 so v7x's 2 TCs
    both get work.  Never falls back to the whole image for non-dividing block_h."""
    if block_h is None or block_h < 1:
        block_h = 16
    divs = [d for d in range(1, H + 1) if H % d == 0 and d <= block_h]
    th = max(divs)  # divs always contains 1
    if B == 1 and th == H and H > 1:
        smaller = [d for d in divs if d <= H // 2]
        if smaller:
            th = max(smaller)
    return th


def conv3x3_relu_nhwc(x_nhwc, weight_oihw, bias, *, block_h=16,
                      compute_dtype=jnp.bfloat16, out_dtype=None,
                      vmem_limit_bytes=None):
    """Conv2d(3x3, stride=1, padding=1) + ReLU on a channels-last activation."""
    B, H, W, Cin = x_nhwc.shape
    Cout = weight_oihw.shape[0]
    assert weight_oihw.shape == (Cout, Cin, 3, 3), weight_oihw.shape
    out_dtype = x_nhwc.dtype if out_dtype is None else out_dtype

    th = _pick_row_tile(H, B, block_h)
    n_tiles = H // th

    # Minimal "same"-conv spatial zero padding (+ one cast pass for the MXU dtype).
    x_pad = jnp.pad(x_nhwc.astype(compute_dtype), ((0, 0), (1, 1), (1, 1), (0, 0)))

    # OIHW -> (kh, kw, Cin, Cout) -> (9*Cin, Cout); no Cout padding.
    w2 = jnp.transpose(weight_oihw, (2, 3, 1, 0)).reshape(9 * Cin, Cout)
    w2 = w2.astype(compute_dtype)
    b2 = bias.astype(jnp.float32).reshape(1, Cout)

    out = pl.pallas_call(
        _conv3x3_relu_kernel,
        out_shape=jax.ShapeDtypeStruct((B, H, W, Cout), out_dtype),
        grid=(B, n_tiles),
        in_specs=[
            # main row block (th rows)
            pl.BlockSpec((1, th, W + 2, Cin), lambda b, j: (b, j, 0, 0)),
            # two 1-row halo blocks (padded rows (j+1)*th and (j+1)*th + 1)
            pl.BlockSpec((1, 1, W + 2, Cin), lambda b, j: (b, (j + 1) * th, 0, 0)),
            pl.BlockSpec((1, 1, W + 2, Cin), lambda b, j: (b, (j + 1) * th + 1, 0, 0)),
            # weights / bias (resident)
            pl.BlockSpec((9 * Cin, Cout), lambda b, j: (0, 0)),
            pl.BlockSpec((1, Cout), lambda b, j: (0, 0)),
        ],
        out_specs=pl.BlockSpec((1, th, W, Cout), lambda b, j: (b, j, 0, 0)),
        scratch_shapes=[pltpu.VMEM((th, W, 9 * Cin), compute_dtype)],
        compiler_params=pltpu.CompilerParams(
            dimension_semantics=("parallel", "parallel"),
            vmem_limit_bytes=vmem_limit_bytes,
        ),
    )(x_pad, x_pad, x_pad, w2, b2)
    return out


def basic_block_forward(x_nchw, weight_oihw, bias, **kwargs):
    """torch BasicBlock(bn=False) forward: NCHW adapter around the NHWC kernel."""
    # TODO(synk): BatchNorm2d branch (bn=True) not implemented; module default is bn=False.
    x_nhwc = jnp.transpose(x_nchw, (0, 2, 3, 1))
    out_nhwc = conv3x3_relu_nhwc(x_nhwc, weight_oihw, bias, **kwargs)
    return jnp.transpose(out_nhwc, (0, 3, 1, 2))


if __name__ == "__main__":
    key = jax.random.PRNGKey(0)
    k_x, k_w, k_b = jax.random.split(key, 3)

    B, Cin, Cout, H, W = 2, 4, 8, 16, 16
    x = jax.random.normal(k_x, (B, Cin, H, W), dtype=jnp.float32)
    weight = jax.random.normal(k_w, (Cout, Cin, 3, 3), dtype=jnp.float32) * 0.1
    bias = jax.random.normal(k_b, (Cout,), dtype=jnp.float32) * 0.1

    def torch_ref(xx, ww, bb):
        r = lax.conv_general_dilated(
            xx, ww, window_strides=(1, 1), padding="SAME",
            dimension_numbers=("NCHW", "OIHW", "NCHW"))
        return jnp.maximum(r + bb[None, :, None, None], 0.0)

    # bf16 MXU inputs, f32 accumulation, multiple row tiles (exercises the
    # 2 halo-row DMAs) vs. a reference computed from the same bf16-rounded inputs.
    out = jax.block_until_ready(basic_block_forward(x, weight, bias, block_h=4))
    ref_bf16 = torch_ref(x.astype(jnp.bfloat16).astype(jnp.float32),
                         weight.astype(jnp.bfloat16).astype(jnp.float32), bias)
    assert out.shape == (B, Cout, H, W)
    assert jnp.allclose(out, ref_bf16, atol=1e-3, rtol=1e-3)

    # f32 compute path (default single row tile) vs. the plain f32 reference.
    out_f32 = jax.block_until_ready(
        basic_block_forward(x, weight, bias, compute_dtype=jnp.float32))
    assert jnp.allclose(out_f32, torch_ref(x, weight, bias), atol=1e-3, rtol=1e-3)

    print("KERNEL_OK")
</pallas_src>

<mosaic_0001>
module attributes {stable_mosaic.version = 11 : i64} {
  func.func @_conv3x3_relu_kernel(%arg0: i32, %arg1: i32, %arg2: memref<1x4x18x4xbf16, #tpu.memory_space<vmem>>, %arg3: memref<1x1x18x4xbf16, #tpu.memory_space<vmem>>, %arg4: memref<1x1x18x4xbf16, #tpu.memory_space<vmem>>, %arg5: memref<36x8xbf16, #tpu.memory_space<vmem>>, %arg6: memref<1x8xf32, #tpu.memory_space<vmem>>, %arg7: memref<1x4x16x8xf32, #tpu.memory_space<vmem>>, %arg8: memref<4x16x36xbf16, #tpu.memory_space<vmem>>) attributes {dimension_semantics = [#tpu.dimension_semantics<parallel>, #tpu.dimension_semantics<parallel>], iteration_bounds = array<i64: 2, 4>, scalar_prefetch = 0 : i64, scratch_operands = 1 : i64, tpu.core_type = #tpu.core_type<tc>, window_params = [{transform_indices = @transform_0, window_bounds = array<i64: 1, 4, 18, 4>}, {transform_indices = @transform_1, window_bounds = array<i64: 1, 1, 18, 4>}, {transform_indices = @transform_2, window_bounds = array<i64: 1, 1, 18, 4>}, {pipeline_mode = #tpu.pipeline_mode<synchronous>, transform_indices = @transform_3, window_bounds = array<i64: 36, 8>}, {pipeline_mode = #tpu.pipeline_mode<synchronous>, transform_indices = @transform_4, window_bounds = array<i64: 1, 8>}, {transform_indices = @transform_5, window_bounds = array<i64: 1, 4, 16, 8>}]} {
    %c0 = arith.constant 0 : index
    %c0_0 = arith.constant 0 : index
    %c0_1 = arith.constant 0 : index
    %c0_2 = arith.constant 0 : index
    %0 = vector.load %arg2[%c0, %c0_0, %c0_1, %c0_2] : memref<1x4x18x4xbf16, #tpu.memory_space<vmem>>, vector<1x4x16x4xbf16>
    %1 = vector.shape_cast %0 : vector<1x4x16x4xbf16> to vector<4x16x4xbf16>
    %c0_3 = arith.constant 0 : index
    %c0_4 = arith.constant 0 : index
    %c0_5 = arith.constant 0 : index
    %2 = vector.load %arg8[%c0_3, %c0_4, %c0_5] : memref<4x16x36xbf16, #tpu.memory_space<vmem>>, vector<4x16x4xbf16>
    tpu.vector_store %arg8[%c0_3, %c0_4, %c0_5], %1 {strides = array<i32>} : memref<4x16x36xbf16, #tpu.memory_space<vmem>>, vector<4x16x4xbf16>,
    %c0_6 = arith.constant 0 : index
    %c0_7 = arith.constant 0 : index
    %c1 = arith.constant 1 : index
    %c0_8 = arith.constant 0 : index
    %3 = vector.load %arg2[%c0_6, %c0_7, %c1, %c0_8] : memref<1x4x18x4xbf16, #tpu.memory_space<vmem>>, vector<1x4x16x4xbf16>
    %4 = vector.shape_cast %3 : vector<1x4x16x4xbf16> to vector<4x16x4xbf16>
    %c0_9 = arith.constant 0 : index
    %c0_10 = arith.constant 0 : index
    %c4 = arith.constant 4 : index
    %5 = vector.load %arg8[%c0_9, %c0_10, %c4] : memref<4x16x36xbf16, #tpu.memory_space<vmem>>, vector<4x16x4xbf16>
    tpu.vector_store %arg8[%c0_9, %c0_10, %c4], %4 {strides = array<i32>} : memref<4x16x36xbf16, #tpu.memory_space<vmem>>, vector<4x16x4xbf16>,
    %c0_11 = arith.constant 0 : index
    %c0_12 = arith.constant 0 : index
    %c2 = arith.constant 2 : index
    %c0_13 = arith.constant 0 : index
    %6 = vector.load %arg2[%c0_11, %c0_12, %c2, %c0_13] : memref<1x4x18x4xbf16, #tpu.memory_space<vmem>>, vector<1x4x16x4xbf16>
    %7 = vector.shape_cast %6 : vector<1x4x16x4xbf16> to vector<4x16x4xbf16>
    %c0_14 = arith.constant 0 : index
    %c0_15 = arith.constant 0 : index
    %c8 = arith.constant 8 : index
    %8 = vector.load %arg8[%c0_14, %c0_15, %c8] : memref<4x16x36xbf16, #tpu.memory_space<vmem>>, vector<4x16x4xbf16>
    tpu.vector_store %arg8[%c0_14, %c0_15, %c8], %7 {strides = array<i32>} : memref<4x16x36xbf16, #tpu.memory_space<vmem>>, vector<4x16x4xbf16>,
    %c0_16 = arith.constant 0 : index
    %c1_17 = arith.constant 1 : index
    %c0_18 = arith.constant 0 : index
    %c0_19 = arith.constant 0 : index
    %9 = vector.load %arg2[%c0_16, %c1_17, %c0_18, %c0_19] : memref<1x4x18x4xbf16, #tpu.memory_space<vmem>>, vector<1x3x16x4xbf16>
    %10 = vector.shape_cast %9 : vector<1x3x16x4xbf16> to vector<3x16x4xbf16>
    %c0_20 = arith.constant 0 : index
    %c0_21 = arith.constant 0 : index
    %c12 = arith.constant 12 : index
    %11 = vector.load %arg8[%c0_20, %c0_21, %c12] : memref<4x16x36xbf16, #tpu.memory_space<vmem>>, vector<3x16x4xbf16>
    tpu.vector_store %arg8[%c0_20, %c0_21, %c12], %10 {strides = array<i32>} : memref<4x16x36xbf16, #tpu.memory_space<vmem>>, vector<3x16x4xbf16>,
    %c0_22 = arith.constant 0 : index
    %c1_23 = arith.constant 1 : index
    %c1_24 = arith.constant 1 : index
    %c0_25 = arith.constant 0 : index
    %12 = vector.load %arg2[%c0_22, %c1_23, %c1_24, %c0_25] : memref<1x4x18x4xbf16, #tpu.memory_space<vmem>>, vector<1x3x16x4xbf16>
    %13 = vector.shape_cast %12 : vector<1x3x16x4xbf16> to vector<3x16x4xbf16>
    %c0_26 = arith.constant 0 : index
    %c0_27 = arith.constant 0 : index
    %c16 = arith.constant 16 : index
    %14 = vector.load %arg8[%c0_26, %c0_27, %c16] : memref<4x16x36xbf16, #tpu.memory_space<vmem>>, vector<3x16x4xbf16>
    tpu.vector_store %arg8[%c0_26, %c0_27, %c16], %13 {strides = array<i32>} : memref<4x16x36xbf16, #tpu.memory_space<vmem>>, vector<3x16x4xbf16>,
    %c0_28 = arith.constant 0 : index
    %c1_29 = arith.constant 1 : index
    %c2_30 = arith.constant 2 : index
    %c0_31 = arith.constant 0 : index
    %15 = vector.load %arg2[%c0_28, %c1_29, %c2_30, %c0_31] : memref<1x4x18x4xbf16, #tpu.memory_space<vmem>>, vector<1x3x16x4xbf16>
    %16 = vector.shape_cast %15 : vector<1x3x16x4xbf16> to vector<3x16x4xbf16>
    %c0_32 = arith.constant 0 : index
    %c0_33 = arith.constant 0 : index
    %c20 = arith.constant 20 : index
    %17 = vector.load %arg8[%c0_32, %c0_33, %c20] : memref<4x16x36xbf16, #tpu.memory_space<vmem>>, vector<3x16x4xbf16>
    tpu.vector_store %arg8[%c0_32, %c0_33, %c20], %16 {strides = array<i32>} : memref<4x16x36xbf16, #tpu.memory_space<vmem>>, vector<3x16x4xbf16>,
    %c0_34 = arith.constant 0 : index
    %c2_35 = arith.constant 2 : index
    %c0_36 = arith.constant 0 : index
    %c0_37 = arith.constant 0 : index
    %18 = vector.load %arg2[%c0_34, %c2_35, %c0_36, %c0_37] : memref<1x4x18x4xbf16, #tpu.memory_space<vmem>>, vector<1x2x16x4xbf16>
    %19 = vector.shape_cast %18 : vector<1x2x16x4xbf16> to vector<2x16x4xbf16>
    %c0_38 = arith.constant 0 : index
    %c0_39 = arith.constant 0 : index
    %c24 = arith.constant 24 : index
    %20 = vector.load %arg8[%c0_38, %c0_39, %c24] : memref<4x16x36xbf16, #tpu.memory_space<vmem>>, vector<2x16x4xbf16>
    tpu.vector_store %arg8[%c0_38, %c0_39, %c24], %19 {strides = array<i32>} : memref<4x16x36xbf16, #tpu.memory_space<vmem>>, vector<2x16x4xbf16>,
    %c0_40 = arith.constant 0 : index
    %c2_41 = arith.constant 2 : index
    %c1_42 = arith.constant 1 : index
    %c0_43 = arith.constant 0 : index
    %21 = vector.load %arg2[%c0_40, %c2_41, %c1_42, %c0_43] : memref<1x4x18x4xbf16, #tpu.memory_space<vmem>>, vector<1x2x16x4xbf16>
    %22 = vector.shape_cast %21 : vector<1x2x16x4xbf16> to vector<2x16x4xbf16>
    %c0_44 = arith.constant 0 : index
    %c0_45 = arith.constant 0 : index
    %c28 = arith.constant 28 : index
    %23 = vector.load %arg8[%c0_44, %c0_45, %c28] : memref<4x16x36xbf16, #tpu.memory_space<vmem>>, vector<2x16x4xbf16>
    tpu.vector_store %arg8[%c0_44, %c0_45, %c28], %22 {strides = array<i32>} : memref<4x16x36xbf16, #tpu.memory_space<vmem>>, vector<2x16x4xbf16>,
    %c0_46 = arith.constant 0 : index
    %c2_47 = arith.constant 2 : index
    %c2_48 = arith.constant 2 : index
    %c0_49 = arith.constant 0 : index
    %24 = vector.load %arg2[%c0_46, %c2_47, %c2_48, %c0_49] : memref<1x4x18x4xbf16, #tpu.memory_space<vmem>>, vector<1x2x16x4xbf16>
    %25 = vector.shape_cast %24 : vector<1x2x16x4xbf16> to vector<2x16x4xbf16>
    %c0_50 = arith.constant 0 : index
    %c0_51 = arith.constant 0 : index
    %c32 = arith.constant 32 : index
    %26 = vector.load %arg8[%c0_50, %c0_51, %c32] : memref<4x16x36xbf16, #tpu.memory_space<vmem>>, vector<2x16x4xbf16>
    tpu.vector_store %arg8[%c0_50, %c0_51, %c32], %25 {strides = array<i32>} : memref<4x16x36xbf16, #tpu.memory_space<vmem>>, vector<2x16x4xbf16>,
    %c0_52 = arith.constant 0 : index
    %c0_53 = arith.constant 0 : index
    %c0_54 = arith.constant 0 : index
    %c0_55 = arith.constant 0 : index
    %27 = vector.load %arg3[%c0_52, %c0_53, %c0_54, %c0_55] : memref<1x1x18x4xbf16, #tpu.memory_space<vmem>>, vector<1x1x16x4xbf16>
    %28 = vector.shape_cast %27 : vector<1x1x16x4xbf16> to vector<16x4xbf16>
    %c0_56 = arith.constant 0 : index
    %c0_57 = arith.constant 0 : index
    %c0_58 = arith.constant 0 : index
    %c0_59 = arith.constant 0 : index
    %29 = vector.load %arg4[%c0_56, %c0_57, %c0_58, %c0_59] : memref<1x1x18x4xbf16, #tpu.memory_space<vmem>>, vector<1x1x16x4xbf16>
    %30 = vector.shape_cast %29 : vector<1x1x16x4xbf16> to vector<16x4xbf16>
    %c3 = arith.constant 3 : index
    %c0_60 = arith.constant 0 : index
    %c12_61 = arith.constant 12 : index
    %31 = vector.load %arg8[%c3, %c0_60, %c12_61] : memref<4x16x36xbf16, #tpu.memory_space<vmem>>, vector<1x16x4xbf16>
    %32 = vector.shape_cast %31 : vector<1x16x4xbf16> to vector<16x4xbf16>
    %33 = vector.shape_cast %28 : vector<16x4xbf16> to vector<1x16x4xbf16>
    tpu.vector_store %arg8[%c3, %c0_60, %c12_61], %33 {strides = array<i32>} : memref<4x16x36xbf16, #tpu.memory_space<vmem>>, vector<1x16x4xbf16>,
    %c2_62 = arith.constant 2 : index
    %c0_63 = arith.constant 0 : index
    %c24_64 = arith.constant 24 : index
    %34 = vector.load %arg8[%c2_62, %c0_63, %c24_64] : memref<4x16x36xbf16, #tpu.memory_space<vmem>>, vector<1x16x4xbf16>
    %35 = vector.shape_cast %34 : vector<1x16x4xbf16> to vector<16x4xbf16>
    %36 = vector.shape_cast %28 : vector<16x4xbf16> to vector<1x16x4xbf16>
    tpu.vector_store %arg8[%c2_62, %c0_63, %c24_64], %36 {strides = array<i32>} : memref<4x16x36xbf16, #tpu.memory_space<vmem>>, vector<1x16x4xbf16>,
    %c3_65 = arith.constant 3 : index
    %c0_66 = arith.constant 0 : index
    %c24_67 = arith.constant 24 : index
    %37 = vector.load %arg8[%c3_65, %c0_66, %c24_67] : memref<4x16x36xbf16, #tpu.memory_space<vmem>>, vector<1x16x4xbf16>
    %38 = vector.shape_cast %37 : vector<1x16x4xbf16> to vector<16x4xbf16>
    %39 = vector.shape_cast %30 : vector<16x4xbf16> to vector<1x16x4xbf16>
    tpu.vector_store %arg8[%c3_65, %c0_66, %c24_67], %39 {strides = array<i32>} : memref<4x16x36xbf16, #tpu.memory_space<vmem>>, vector<1x16x4xbf16>,
    %c0_68 = arith.constant 0 : index
    %c0_69 = arith.constant 0 : index
    %c1_70 = arith.constant 1 : index
    %c0_71 = arith.constant 0 : index
    %40 = vector.load %arg3[%c0_68, %c0_69, %c1_70, %c0_71] : memref<1x1x18x4xbf16, #tpu.memory_space<vmem>>, vector<1x1x16x4xbf16>
    %41 = vector.shape_cast %40 : vector<1x1x16x4xbf16> to vector<16x4xbf16>
    %c0_72 = arith.constant 0 : index
    %c0_73 = arith.constant 0 : index
    %c1_74 = arith.constant 1 : index
    %c0_75 = arith.constant 0 : index
    %42 = vector.load %arg4[%c0_72, %c0_73, %c1_74, %c0_75] : memref<1x1x18x4xbf16, #tpu.memory_space<vmem>>, vector<1x1x16x4xbf16>
    %43 = vector.shape_cast %42 : vector<1x1x16x4xbf16> to vector<16x4xbf16>
    %c3_76 = arith.constant 3 : index
    %c0_77 = arith.constant 0 : index
    %c16_78 = arith.constant 16 : index
    %44 = vector.load %arg8[%c3_76, %c0_77, %c16_78] : memref<4x16x36xbf16, #tpu.memory_space<vmem>>, vector<1x16x4xbf16>
    %45 = vector.shape_cast %44 : vector<1x16x4xbf16> to vector<16x4xbf16>
    %46 = vector.shape_cast %41 : vector<16x4xbf16> to vector<1x16x4xbf16>
    tpu.vector_store %arg8[%c3_76, %c0_77, %c16_78], %46 {strides = array<i32>} : memref<4x16x36xbf16, #tpu.memory_space<vmem>>, vector<1x16x4xbf16>,
    %c2_79 = arith.constant 2 : index
    %c0_80 = arith.constant 0 : index
    %c28_81 = arith.constant 28 : index
    %47 = vector.load %arg8[%c2_79, %c0_80, %c28_81] : memref<4x16x36xbf16, #tpu.memory_space<vmem>>, vector<1x16x4xbf16>
    %48 = vector.shape_cast %47 : vector<1x16x4xbf16> to vector<16x4xbf16>
    %49 = vector.shape_cast %41 : vector<16x4xbf16> to vector<1x16x4xbf16>
    tpu.vector_store %arg8[%c2_79, %c0_80, %c28_81], %49 {strides = array<i32>} : memref<4x16x36xbf16, #tpu.memory_space<vmem>>, vector<1x16x4xbf16>,
    %c3_82 = arith.constant 3 : index
    %c0_83 = arith.constant 0 : index
    %c28_84 = arith.constant 28 : index
    %50 = vector.load %arg8[%c3_82, %c0_83, %c28_84] : memref<4x16x36xbf16, #tpu.memory_space<vmem>>, vector<1x16x4xbf16>
    %51 = vector.shape_cast %50 : vector<1x16x4xbf16> to vector<16x4xbf16>
    %52 = vector.shape_cast %43 : vector<16x4xbf16> to vector<1x16x4xbf16>
    tpu.vector_store %arg8[%c3_82, %c0_83, %c28_84], %52 {strides = array<i32>} : memref<4x16x36xbf16, #tpu.memory_space<vmem>>, vector<1x16x4xbf16>,
    %c0_85 = arith.constant 0 : index
    %c0_86 = arith.constant 0 : index
    %c2_87 = arith.constant 2 : index
    %c0_88 = arith.constant 0 : index
    %53 = vector.load %arg3[%c0_85, %c0_86, %c2_87, %c0_88] : memref<1x1x18x4xbf16, #tpu.memory_space<vmem>>, vector<1x1x16x4xbf16>
    %54 = vector.shape_cast %53 : vector<1x1x16x4xbf16> to vector<16x4xbf16>
    %c0_89 = arith.constant 0 : index
    %c0_90 = arith.constant 0 : index
    %c2_91 = arith.constant 2 : index
    %c0_92 = arith.constant 0 : index
    %55 = vector.load %arg4[%c0_89, %c0_90, %c2_91, %c0_92] : memref<1x1x18x4xbf16, #tpu.memory_space<vmem>>, vector<1x1x16x4xbf16>
    %56 = vector.shape_cast %55 : vector<1x1x16x4xbf16> to vector<16x4xbf16>
    %c3_93 = arith.constant 3 : index
    %c0_94 = arith.constant 0 : index
    %c20_95 = arith.constant 20 : index
    %57 = vector.load %arg8[%c3_93, %c0_94, %c20_95] : memref<4x16x36xbf16, #tpu.memory_space<vmem>>, vector<1x16x4xbf16>
    %58 = vector.shape_cast %57 : vector<1x16x4xbf16> to vector<16x4xbf16>
    %59 = vector.shape_cast %54 : vector<16x4xbf16> to vector<1x16x4xbf16>
    tpu.vector_store %arg8[%c3_93, %c0_94, %c20_95], %59 {strides = array<i32>} : memref<4x16x36xbf16, #tpu.memory_space<vmem>>, vector<1x16x4xbf16>,
    %c2_96 = arith.constant 2 : index
    %c0_97 = arith.constant 0 : index
    %c32_98 = arith.constant 32 : index
    %60 = vector.load %arg8[%c2_96, %c0_97, %c32_98] : memref<4x16x36xbf16, #tpu.memory_space<vmem>>, vector<1x16x4xbf16>
    %61 = vector.shape_cast %60 : vector<1x16x4xbf16> to vector<16x4xbf16>
    %62 = vector.shape_cast %54 : vector<16x4xbf16> to vector<1x16x4xbf16>
    tpu.vector_store %arg8[%c2_96, %c0_97, %c32_98], %62 {strides = array<i32>} : memref<4x16x36xbf16, #tpu.memory_space<vmem>>, vector<1x16x4xbf16>,
    %c3_99 = arith.constant 3 : index
    %c0_100 = arith.constant 0 : index
    %c32_101 = arith.constant 32 : index
    %63 = vector.load %arg8[%c3_99, %c0_100, %c32_101] : memref<4x16x36xbf16, #tpu.memory_space<vmem>>, vector<1x16x4xbf16>
    %64 = vector.shape_cast %63 : vector<1x16x4xbf16> to vector<16x4xbf16>
    %65 = vector.shape_cast %56 : vector<16x4xbf16> to vector<1x16x4xbf16>
    tpu.vector_store %arg8[%c3_99, %c0_100, %c32_101], %65 {strides = array<i32>} : memref<4x16x36xbf16, #tpu.memory_space<vmem>>, vector<1x16x4xbf16>,
    %c0_102 = arith.constant 0 : index
    %c0_103 = arith.constant 0 : index
    %c0_104 = arith.constant 0 : index
    %66 = vector.load %arg8[%c0_102, %c0_103, %c0_104] : memref<4x16x36xbf16, #tpu.memory_space<vmem>>, vector<4x16x36xbf16>
    %67 = vector.shape_cast %66 : vector<4x16x36xbf16> to vector<64x36xbf16>
    %c0_105 = arith.constant 0 : index
    %c0_106 = arith.constant 0 : index
    %68 = vector.load %arg5[%c0_105, %c0_106] : memref<36x8xbf16, #tpu.memory_space<vmem>>, vector<36x8xbf16>
    %cst = arith.constant dense<0.000000e+00> : vector<64x8xf32>
    %69 = tpu.matmul %67, %68, %cst {dimension_numbers = #tpu.dot_dimension_numbers<[1], [0], [0], [1], [0, 0, 1, 1], [], []>} : vector<64x36xbf16>, vector<36x8xbf16>, vector<64x8xf32> -> vector<64x8xf32>
    %70 = vector.shape_cast %69 : vector<64x8xf32> to vector<4x16x8xf32>
    %c0_107 = arith.constant 0 : index
    %c0_108 = arith.constant 0 : index
    %71 = vector.load %arg6[%c0_107, %c0_108] : memref<1x8xf32, #tpu.memory_space<vmem>>, vector<1x8xf32>
    %72 = vector.shape_cast %71 : vector<1x8xf32> to vector<1x1x8xf32>
    %73 = vector.broadcast %72 : vector<1x1x8xf32> to vector<4x16x8xf32>
    %74 = arith.addf %70, %73 : vector<4x16x8xf32>
    %cst_109 = arith.constant 0.000000e+00 : f32
    %75 = vector.broadcast %cst_109 : f32 to vector<4x16x8xf32>
    %76 = arith.maximumf %74, %75 : vector<4x16x8xf32>
    %c0_110 = arith.constant 0 : index
    %c0_111 = arith.constant 0 : index
    %c0_112 = arith.constant 0 : index
    %c0_113 = arith.constant 0 : index
    %77 = vector.load %arg7[%c0_110, %c0_111, %c0_112, %c0_113] : memref<1x4x16x8xf32, #tpu.memory_space<vmem>>, vector<1x4x16x8xf32>
    %78 = vector.shape_cast %77 : vector<1x4x16x8xf32> to vector<4x16x8xf32>
    %79 = vector.shape_cast %76 : vector<4x16x8xf32> to vector<1x4x16x8xf32>
    tpu.vector_store %arg7[%c0_110, %c0_111, %c0_112, %c0_113], %79 {strides = array<i32>} : memref<1x4x16x8xf32, #tpu.memory_space<vmem>>, vector<1x4x16x8xf32>,
    return
  }
  func.func @transform_0(%arg0: i32, %arg1: i32) -> (i32, i32, i32, i32) {
    %c0_i32 = arith.constant 0 : i32
    %c0_i32_0 = arith.constant 0 : i32
    %c0_i32_1 = arith.constant 0 : i32
    return %arg0, %arg1, %c0_i32, %c0_i32_0 : i32, i32, i32, i32
  }
  func.func @transform_1(%arg0: i32, %arg1: i32) -> (i32, i32, i32, i32) {
    %c1_i32 = arith.constant 1 : i32
    %0 = arith.addi %arg1, %c1_i32 : i32
    %c4_i32 = arith.constant 4 : i32
    %1 = arith.muli %0, %c4_i32 : i32
    %c0_i32 = arith.constant 0 : i32
    %c0_i32_0 = arith.constant 0 : i32
    %c0_i32_1 = arith.constant 0 : i32
    return %arg0, %1, %c0_i32, %c0_i32_0 : i32, i32, i32, i32
  }
  func.func @transform_2(%arg0: i32, %arg1: i32) -> (i32, i32, i32, i32) {
    %c1_i32 = arith.constant 1 : i32
    %0 = arith.addi %arg1, %c1_i32 : i32
    %c4_i32 = arith.constant 4 : i32
    %1 = arith.muli %0, %c4_i32 : i32
    %c1_i32_0 = arith.constant 1 : i32
    %2 = arith.addi %1, %c1_i32_0 : i32
    %c0_i32 = arith.constant 0 : i32
    %c0_i32_1 = arith.constant 0 : i32
    %c0_i32_2 = arith.constant 0 : i32
    return %arg0, %2, %c0_i32, %c0_i32_1 : i32, i32, i32, i32
  }
  func.func @transform_3(%arg0: i32, %arg1: i32) -> (i32, i32) {
    %c0_i32 = arith.constant 0 : i32
    %c0_i32_0 = arith.constant 0 : i32
    %c0_i32_1 = arith.constant 0 : i32
    return %c0_i32, %c0_i32_0 : i32, i32
  }
  func.func @transform_4(%arg0: i32, %arg1: i32) -> (i32, i32) {
    %c0_i32 = arith.constant 0 : i32
    %c0_i32_0 = arith.constant 0 : i32
    %c0_i32_1 = arith.constant 0 : i32
    return %c0_i32, %c0_i32_0 : i32, i32
  }
  func.func @transform_5(%arg0: i32, %arg1: i32) -> (i32, i32, i32, i32) {
    %c0_i32 = arith.constant 0 : i32
    %c0_i32_0 = arith.constant 0 : i32
    %c0_i32_1 = arith.constant 0 : i32
    return %arg0, %arg1, %c0_i32, %c0_i32_0 : i32, i32, i32, i32
  }
}

</mosaic_0001>

<bundles_post_ra>
// kernel: tpu_custom_call.1
= control target key start
LH: loop header
LB: loop body
LE: loop exit
PB: predicated region body
PF: predicated region fallthrough
CT: control target
= control target key end

     0   :  { %s1665_s18 = smov 0   ;;  %s1667_s19 = smov 0   ;;  %s1925_s0 = inlined_call_operand.vmem [shape: bf16[2,18,18,4], index: 0, kind: input, shape index: {}]   ;;  %s1926_s1 = inlined_call_operand.vmem [shape: bf16[2,18,18,4], index: 1, kind: input, shape index: {}]   ;;  %s1927_s2 = inlined_call_operand.vmem [shape: bf16[2,18,18,4], index: 2, kind: input, shape index: {}]   ;;  %s1928_s3 = inlined_call_operand.vmem [shape: bf16[36,8], index: 3, kind: input, shape index: {}]   ;;  %s1929_s4 = inlined_call_operand.vmem [shape: f32[1,8], index: 4, kind: input, shape index: {}]   ;;  %s1930_s5 = inlined_call_operand.vmem [shape: f32[2,16,16,8], index: 5, kind: output, shape index: {}]  }
   0x1   :  { %s1669_s20 = smov 0   ;;  %s1671_s21 = smov 0  }
   0x2   :  { %s1673_s22 = smov 0  }
   0x3 LB: > { %s24_s23 = sadd.s32 1, %s1617_s20  ;;  %s27_s24 = sadd.s32 1, %s1621_s21  ;;  %s1625_s22 = sphi %s1673_s22, %s15_s22   ;;  %s1621_s21 = sphi %s1671_s21, %s1935_s21   ;;  %s1617_s20 = sphi %s1669_s20, %s1934_s20   ;;  %s1613_s19 = sphi %s1667_s19, %s1933_s19   ;;  %s1609_s18 = sphi %s1665_s18, %s1932_s18  }
   0x4   : > { %p25_p0 = scmp.ge.s32.totalorder %s24_s23, 4  ;;  %p1320_p1 = scmp.ge.s32.totalorder %s1625_s22, 1 }
   0x5   : > { %p271_p2 = scmp.lt.s32.totalorder %s1625_s22, 9 }
   0x6   : > { %s1937_s23 = smov (%p25_p0, %s24_s23), 0  ;;  %s1939_s24 = smov (!%p25_p0, %s27_s24), %s1621_s21 }
   0x7   : > { %p272_p3 = pnand %p1320_p1, %p271_p2  ;;  %p29_p4 = scmp.ge.s32.totalorder %s1939_s24, 2 }
   0x8   : > { %s1695_s25 = sshll.u32 (!%p272_p3), %s1609_s18, 2  ;;  %p343_p5 = scmp.lt.s32.totalorder (!%p272_p3), %s1613_s19, 1  ;;  %vm589_vm0 = vcmask (!%p272_p3), 1046528   ;;  %vm479_vm1 = vsmask.f32 (!%p272_p3), 7424  ;;  %vm430_vm2 = vcmask (!%p272_p3), 31744  }
   0x9   : > { %s1941_s24 = smov (%p29_p4, %s1939_s24), 0  ;;  %275 = sbr.rel (%p272_p3) target bundleno = 428 (0x1ac), region = 40 }
   0xa   : > { %p345_p6 = scmp.lt.s32.totalorder (!%p272_p3), %s1695_s25, 17  ;;  %s1705_s29 = sadd.s32 (!%p272_p3), 4, %s1695_s25  ;;  %vm1070_vm3 = vcmask (!%p272_p3), 1041408   ;;  %vm540_vm4 = vcmask (!%p272_p3), 64544   ;;  %vm614_vm5 = vcmask (!%p272_p3), 97344   ;;  %vm650_vm6 = vcmask (!%p272_p3), 130144  }
   0xb   : > { %p362_p7 = scmp.lt.s32.totalorder (!%p272_p3), %s1705_s29, 17  ;;  %s373_s11 = sadd.s32 (!%p272_p3), 1, %s1705_s29  ;;  %vm732_vm7 = vcmask (!%p272_p3), 162944   ;;  %vm787_vm8 = vcmask (!%p272_p3), 195744   ;;  %vm812_vm9 = vcmask (!%p272_p3), 228544   ;;  %vm867_vm10 = vcmask (!%p272_p3), 261344  }
   0xc   : > { %s1627_s12 = smov (!%p272_p3), 12   ;;  %s1628_s14 = smov (!%p272_p3), 8   ;;  %vm904_vm11 = vcmask (!%p272_p3), 294144   ;;  %vm1057_vm12 = vcmask (!%p272_p3), 293888   ;;  %vm1162_vm13 = vcmask (!%p272_p3), 64512  }
   0xd   : > { %s1629_s15 = smov (!%p272_p3), 4   ;;  %p1761_p8 = scmp.lt.s32.totalorder (!%p272_p3), %s373_s11, 17 }
   0xe   : > { %p389_p9 = scmp.lt.s32.totalorder (!%p272_p3), %s1695_s25, 15 }
  0x10   : > { %s1943_s19 = smov (!%p343_p5, %s1613_s19), 1  ;;  %s1945_s11 = smov (!%p1761_p8, %s373_s11), 17 }
  0x11   : > { %s346_s26 = scalar_select %p345_p6, %s1695_s25, 17 }
  0x12   : > { %s1702_s27 = smul.u32 54, %s1943_s19  ;;  %s1947_s25 = smov (!%p389_p9, %s1695_s25), 15 }
  0x13   : > { %s1477_s28 = smul.u32 3, %s346_s26 }
  0x14   : > { %s1716_s10 = scalar_select %p362_p7, %s1705_s29, 17 }
  0x15   : > { %s349_s30 = sadd.s32 %s1702_s27, %s1477_s28  ;;  %s1480_s7 = smul.u32 3, %s1945_s11 }
  0x16   : > { %s1322_s6 = sshll.u32 %s349_s30, 2  ;;  %s1479_s13 = smul.u32 3, %s1716_s10 }
  0x17   : > { %s1712_s9 = scalar_lea.vmem %s1925_s0, %s1322_s6  ;;  %s1630_s6 = smov 16  }
  0x18   : > { %v1529_v0 = vld [vmem:[%s1712_s9 + $0x24] sm:$0xff]   ;;  %v1530_v1 = vld [vmem:[%s1712_s9 + $0xc] sm:$0xff]   ;;  %v1531_v2 = vld [vmem:[%s1712_s9 + $0x18] sm:$0xff]   ;;  %s366_s16 = sadd.s32 %s1479_s13, %s1702_s27  ;;  %s380_s29 = sadd.s32 %s1480_s7, %s1702_s27 }
  0x19   : > { %645 = vrot.lane.b32.xlu1 %v1529_v0, %s1627_s12  ;;  %641 = vrot.lane.b32.xlu0 %v1530_v1, %s1627_s12  ;;  %v1532_v3 = vld [vmem:[%s1712_s9 + $0x18] sm:$0xfe]   ;;  %v1533_v4 = vld [vmem:[%s1712_s9 + $0x20] ss:$0 sps:$4 sm:$0x11]   ;;  %s1324_s17 = sshll.u32 %s366_s16, 2 }
  0x1a   : > { %v1540_v5 = vld [vmem:[%s1712_s9 + $0xc] sm:$0xff]   ;;  %v596_v6 = vrot.slane %v1532_v3, 1  ;;  %v597_v7 = vrot.slane %v1533_v4, 1  ;;  %v1534_v8 = vld [vmem:[%s1712_s9 + $0x24] sm:$0xfe]   ;;  %v1548_v50 = vld [vmem:[%s1712_s9 + $0x18] sm:$0xff]   ;;  %s1757_s28 = scalar_lea.vmem %s1926_s1, %s1324_s17 }
  0x1b   : > { %v1535_v9 = vld [vmem:[%s1712_s9 + $0x2c] ss:$0 sps:$4 sm:$0x11]   ;;  %v493_v10 = vshrl.u32 %v1540_v5, 16  ;;  %v599_v12 = vrot.slane %v1534_v8, 1  ;;  %v495_v14 = vshll.u32 %v1540_v5, 16 }
  0x1c   : > { %v598_v11 = vsel %vm589_vm0, %v596_v6, %v597_v7  ;;  %v1536_v13 = vld [vmem:[%s1712_s9] sm:$0xfe]   ;;  %v600_v15 = vrot.slane %v1535_v9, 1  ;;  %v1537_v16 = vld [vmem:[%s1712_s9 + $0x8] ss:$0 sps:$4 sm:$0x11]  }
  0x1d   : > { %643 = vrot.lane.b32.xlu0 %v1531_v2, %s1627_s12  ;;  %606 = vrot.lane.b32.xlu1 %v598_v11, %s1628_s14  ;;  %v590_v17 = vrot.slane %v1536_v13, 1  ;;  %v497_v18 = vrot.slane %v495_v14, 1  ;;  %v591_v20 = vrot.slane %v1537_v16, 1  ;;  %v1538_v21 = vld [vmem:[%s1712_s9 + $0xc] sm:$0xfe]   ;;  %v1542_v27 = vld [vmem:[%s1712_s9 + $0x24] sm:$0xff]  }
  0x1e   : > { %v601_v19 = vsel %vm589_vm0, %v599_v12, %v600_v15  ;;  %v1539_v22 = vld [vmem:[%s1712_s9 + $0x14] ss:$0 sps:$4 sm:$0x11]   ;;  %v593_v24 = vrot.slane %v1538_v21, 1  ;;  %v517_v32 = vshrl.u32 %v1542_v27, 16  ;;  %v519_v33 = vshll.u32 %v1542_v27, 16 }
  0x1f   : > { %v592_v23 = vsel %vm589_vm0, %v590_v17, %v591_v20  ;;  %v594_v25 = vrot.slane %v1539_v22, 1  ;;  %v1541_v26 = vld [vmem:[%s1712_s9 + $0x14] ss:$0 sps:$4 sm:$0x11]   ;;  %v498_v28 = vor.u32 %v497_v18, %v493_v10  ;;  %v1544_v37 = vld [vmem:[%s1712_s9] sm:$0xff]   ;;  %v1546_v39 = vld [vmem:[%s1712_s9 + $0xc] sm:$0xff]  }
  0x20   : > { %v500_v30 = vshll.u32 %v1541_v26, 16  ;;  %v1543_v31 = vld [vmem:[%s1712_s9 + $0x2c] ss:$0 sps:$4 sm:$0x11]   ;;  %v521_v35 = vrot.slane %v519_v33, 1  ;;  %v481_v43 = vshrl.u32 %v1544_v37, 16 }
  0x21   : > { %608 = vrot.lane.b32.xlu1 %v601_v19, %s1628_s14  ;;  %602 = vrot.lane.b32.xlu0 %v592_v23, %s1628_s14  ;;  %v595_v29 = vsel %vm589_vm0, %v593_v24, %v594_v25  ;;  %v524_v36 = vshll.u32 %v1543_v31, 16  ;;  %v1545_v38 = vld [vmem:[%s1712_s9 + $0x8] ss:$0 sps:$4 sm:$0x11]   ;;  %v483_v44 = vshll.u32 %v1544_v37, 16  ;;  %v688_v47 = vshrl.u32 %v1546_v39, 16 }
  0x22   : > { %v502_v34 = vrot.slane %v500_v30, 1  ;;  %v522_v41 = vor.u32 %v521_v35, %v517_v32  ;;  %v488_v45 = vshll.u32 %v1545_v38, 16  ;;  %v1547_v46 = vld [vmem:[%s1712_s9 + $0x14] ss:$0 sps:$4 sm:$0x11]   ;;  %v690_v49 = vshll.u32 %v1546_v39, 16 }
  0x23   : > { %v526_v42 = vrot.slane %v524_v36, 1  ;;  %v485_v51 = vrot.slane %v483_v44, 1  ;;  %v695_v53 = vshll.u32 %v1547_v46, 16  ;;  %v1549_v54 = vld [vmem:[%s1712_s9 + $0x20] ss:$0 sps:$4 sm:$0x11]  }
  0x24   : > { %v503_v40 = vsel %vm479_vm1, %v498_v28, %v502_v34  ;;  %v490_v52 = vrot.slane %v488_v45, 1  ;;  %v692_v55 = vrot.slane %v690_v49, 1  ;;  %v505_v56 = vshrl.u32 %v1548_v50, 16  ;;  %v1767_v1 = vld [vmem:[%s1757_s28] sm:$0xff]   ;;  %v1555_v4 = vld [vmem:[%s1712_s9 + $0x18] sm:$0xff]   ;;  %s1326_s8 = sshll.u32 %s380_s29, 2 }
  0x25   : > { %604 = vrot.lane.b32.xlu0 %v595_v29, %s1628_s14  ;;  %530 = vrot.lane.b32.xlu1 %v503_v40, %s1629_s15  ;;  %v527_v48 = vsel %vm479_vm1, %v522_v41, %v526_v42  ;;  %v507_v57 = vshll.u32 %v1548_v50, 16  ;;  %v486_v58 = vor.u32 %v485_v51, %v481_v43  ;;  %v697_v59 = vrot.slane %v695_v53, 1  ;;  %v1551_v2 = vld [vmem:[%s1712_s9 + $0x24] sm:$0xff]   ;;  %v1552_v3 = vld [vmem:[%s1712_s9 + $0x2c] ss:$0 sps:$4 sm:$0x11]   ;;  %s1797_s13 = scalar_lea.vmem %s1927_s2, %s1326_s8 }
  0x26   : > { %v512_v60 = vshll.u32 %v1549_v54, 16  ;;  %v693_v61 = vor.u32 %v692_v55, %v688_v47  ;;  %v712_v7 = vshrl.u32 %v1551_v2, 16  ;;  %v714_v8 = vshll.u32 %v1551_v2, 16  ;;  %v1553_v10 = vld [vmem:[%s1712_s9 + $0xc] sm:$0xfe]   ;;  %v1563_v28 = vld [vmem:[%s1757_s28] sm:$0xff]  }
  0x27   : > { %v509_v62 = vrot.slane %v507_v57, 1  ;;  %v491_v63 = vsel %vm479_vm1, %v486_v58, %v490_v52  ;;  %v719_v9 = vshll.u32 %v1552_v3, 16  ;;  %v700_v11 = vshrl.u32 %v1555_v4, 16  ;;  %v1554_v13 = vld [vmem:[%s1712_s9 + $0x14] ss:$0 sps:$4 sm:$0x11]  }
  0x28   : > { %v514_v0 = vrot.slane %v512_v60, 1  ;;  %v698_v5 = vsel %vm479_vm1, %v693_v61, %v697_v59  ;;  %v702_v14 = vshll.u32 %v1555_v4, 16  ;;  %v716_v15 = vrot.slane %v714_v8, 1  ;;  %v1556_v19 = vld [vmem:[%s1712_s9 + $0x20] ss:$0 sps:$4 sm:$0x11]  }
  0x29   : > { %534 = vrot.lane.b32.xlu1 %v527_v48, %s1629_s15  ;;  %528 = vrot.lane.b32.xlu0 %v491_v63, %s1629_s15  ;;  %v510_v6 = vor.u32 %v509_v62, %v505_v56  ;;  %v721_v16 = vrot.slane %v719_v9, 1  ;;  %v769_v17 = vrot.slane %v1553_v10, 1  ;;  %v770_v18 = vrot.slane %v1554_v13, 1  ;;  %v1558_v26 = vld [vmem:[%s1712_s9 + $0x24] sm:$0xfe]   ;;  %s1631_s10 = smov 20  }
  0x2a   : > { %v717_v20 = vor.u32 %v716_v15, %v712_v7  ;;  %v704_v21 = vrot.slane %v702_v14, 1  ;;  %v707_v23 = vshll.u32 %v1556_v19, 16  ;;  %v1559_v27 = vld [vmem:[%s1712_s9 + $0x2c] ss:$0 sps:$4 sm:$0x11]   ;;  %v775_v30 = vrot.slane %v1558_v26, 1 }
  0x2b   : > { %v515_v12 = vsel %vm479_vm1, %v510_v6, %v514_v0  ;;  %v771_v22 = vsel %vm589_vm0, %v769_v17, %v770_v18  ;;  %v776_v31 = vrot.slane %v1559_v27, 1  ;;  %v1557_v33 = vld [vmem:[%s1797_s13] sm:$0xff]   ;;  %v950_v34 = vshrl.u32 %v1563_v28, 16  ;;  %v1565_v35 = vld [vmem:[%s1712_s9 + $0x18] sm:$0xff]   ;;  %s1632_s27 = smov 24   ;;  %s1633_s14 = smov 28  }
  0x2c   : > { %v722_v24 = vsel %vm479_vm1, %v717_v20, %v721_v16  ;;  %v705_v25 = vor.u32 %v704_v21, %v700_v11  ;;  %v709_v29 = vrot.slane %v707_v23, 1  ;;  %v1560_v36 = vld [vmem:[%s1712_s9 + $0x18] sm:$0xff]   ;;  %v1562_v38 = vld [vmem:[%s1712_s9 + $0x20] ss:$0 sps:$4 sm:$0x11]   ;;  %v952_v39 = vshll.u32 %v1563_v28, 16 }
  0x2d   : > { %723 = vrot.lane.b32.xlu1 %v698_v5, %s1630_s6  ;;  %532 = vrot.lane.b32.xlu0 %v515_v12, %s1629_s15  ;;  %v1561_v37 = vld [vmem:[%s1712_s9 + $0x18] sm:$0xfe]   ;;  %v777_v40 = vsel %vm589_vm0, %v775_v30, %v776_v31  ;;  %v1564_v42 = vld [vmem:[%s1757_s28 + $0x8] ss:$0 sps:$4 sm:$0x11]   ;;  %v773_v43 = vrot.slane %v1562_v38, 1 }
  0x2e   : > { %v710_v32 = vsel %vm479_vm1, %v705_v25, %v709_v29  ;;  %v772_v41 = vrot.slane %v1561_v37, 1  ;;  %v954_v44 = vrot.slane %v952_v39, 1  ;;  %v957_v45 = vshll.u32 %v1564_v42, 16  ;;  %v1566_v46 = vld [vmem:[%s1712_s9 + $0x20] ss:$0 sps:$4 sm:$0x11]  }
  0x2f   : > { %v838_v48 = vshrl.u32 %v1565_v35, 16  ;;  %v840_v49 = vshll.u32 %v1565_v35, 16  ;;  %v845_v52 = vshll.u32 %v1566_v46, 16  ;;  %v1568_v54 = vld [vmem:[%s1797_s13] sm:$0xff]   ;;  %v1570_v62 = vld [vmem:[%s1712_s9 + $0x18] sm:$0xfe]  }
  0x30   : > { %v955_v47 = vor.u32 %v954_v44, %v950_v34  ;;  %v774_v50 = vsel %vm589_vm0, %v772_v41, %v773_v43  ;;  %v959_v51 = vrot.slane %v957_v45, 1  ;;  %v1569_v57 = vld [vmem:[%s1797_s13 + $0x8] ss:$0 sps:$4 sm:$0x11]   ;;  %v978_v59 = vshrl.u32 %v1568_v54, 16  ;;  %s1634_s15 = smov 32  }
  0x31   : > { %916 = vrot.lane.b32.xlu1 %v1767_v1, %s1627_s12  ;;  %727 = vrot.lane.b32.xlu0 %v722_v24, %s1630_s6  ;;  %v842_v53 = vrot.slane %v840_v49, 1  ;;  %v847_v56 = vrot.slane %v845_v52, 1  ;;  %v980_v60 = vshll.u32 %v1568_v54, 16  ;;  %v985_v61 = vshll.u32 %v1569_v57, 16  ;;  %v1567_v3 = vld [vmem:[%s1712_s9 + $0x24] sm:$0xff]   ;;  %s1328_s30 = sshll.u32 %s1947_s25, 1 }
  0x32   : > { %v960_v55 = vsel %vm479_vm1, %v955_v47, %v959_v51  ;;  %v1571_v63 = vld [vmem:[%s1712_s9 + $0x20] ss:$0 sps:$4 sm:$0x11]   ;;  %v892_v5 = vrot.slane %v1570_v62, 1  ;;  %v1572_v6 = vld [vmem:[%s1712_s9 + $0x24] sm:$0xff]  }
  0x33   : > { %v843_v58 = vor.u32 %v842_v53, %v838_v48  ;;  %v982_v2 = vrot.slane %v980_v60, 1  ;;  %v987_v4 = vrot.slane %v985_v61, 1  ;;  %v893_v8 = vrot.slane %v1571_v63, 1  ;;  %v1573_v9 = vld [vmem:[%s1712_s9 + $0x2c] ss:$0 sps:$4 sm:$0x11]  }
  0x34   : > { %v850_v10 = vshrl.u32 %v1572_v6, 16  ;;  %v852_v11 = vshll.u32 %v1572_v6, 16  ;;  %v857_v13 = vshll.u32 %v1573_v9, 16  ;;  %v1574_v14 = vld [vmem:[%s1757_s28] sm:$0xfe]   ;;  %v1585_v34 = vld [vmem:[%s1928_s3 + $0x8] sm:$0xff]  }
  0x35   : > { %778 = vrot.lane.b32.xlu1 %v771_v22, %s1631_s10  ;;  %725 = vrot.lane.b32.xlu0 %v710_v32, %s1630_s6  ;;  %v848_v0 = vsel %vm479_vm1, %v843_v58, %v847_v56  ;;  %v983_v7 = vor.u32 %v982_v2, %v978_v59  ;;  %v1575_v15 = vld [vmem:[%s1757_s28 + $0x8] ss:$0 sps:$4 sm:$0x11]   ;;  %v1007_v17 = vrot.slane %v1574_v14, 1  ;;  %v1576_v20 = vld [vmem:[%s1797_s13] sm:$0xfe]   ;;  %v894_v23 = vsel %vm589_vm0, %v892_v5, %v893_v8 }
  0x36   : > { %v854_v16 = vrot.slane %v852_v11, 1  ;;  %v1008_v18 = vrot.slane %v1575_v15, 1  ;;  %v1577_v21 = vld [vmem:[%s1797_s13 + $0x8] ss:$0 sps:$4 sm:$0x11]   ;;  %v1580_v22 = vld [vmem:[%s1712_s9 + $0xc] sm:$0xff]  }
  0x37   : > { %v988_v12 = vsel %vm479_vm1, %v983_v7, %v987_v4  ;;  %v1578_v24 = vld [vmem:[%s1712_s9 + $0x24] sm:$0xfe]   ;;  %432 = vst.msk [vmem:[#allocation2 + $0x8] sm:$0xff] %vm430_vm2, %v1580_v22  ;;  %v1579_v25 = vld [vmem:[%s1712_s9 + $0x2c] ss:$0 sps:$4 sm:$0x11]  }
  0x38   : > { %v855_v19 = vor.u32 %v854_v16, %v850_v10  ;;  %v1581_v26 = vld [vmem:[%s1712_s9 + $0x24] sm:$0xff]   ;;  %v1009_v29 = vsel %vm589_vm0, %v1007_v17, %v1008_v18  ;;  %v1026_v30 = vrot.slane %v1576_v20, 1  ;;  %v1027_v31 = vrot.slane %v1577_v21, 1  ;;  %v1583_v32 = vld [vmem:[%s1712_s9 + $0x18] sm:$0xff]   ;;  %v1433_v14 = vld [vmem:[%s1929_s4] ss:$0 sm:$0xff] }
  0x39   : > { %931 = vrot.lane.b32.xlu1 %v1557_v33, %s1632_s27  ;;  %782 = vrot.lane.b32.xlu0 %v777_v40, %s1631_s10  ;;  %v1582_v28 = vld [vmem:[%s1712_s9] sm:$0xff]   ;;  %434 = vst.msk [vmem:[#allocation2 + $0x18] sm:$0xff] %vm430_vm2, %v1581_v26  ;;  %v895_v35 = vrot.slane %v1578_v24, 1  ;;  %433 = vst.msk [vmem:[#allocation2 + $0x10] sm:$0xff] %vm430_vm2, %v1583_v32 }
  0x3a   : > { %431 = vst.msk [vmem:[#allocation2] sm:$0xff] %vm430_vm2, %v1582_v28  ;;  %v1584_v33 = vld [vmem:[%s1928_s3] sm:$0xff]   ;;  %v1028_v37 = vsel %vm589_vm0, %v1026_v30, %v1027_v31  ;;  %v1586_v38 = vld [vmem:[%s1928_s3 + $0x10] ss:$0 sps:$4 sm:$0x33]  }
  0x3b   : > { %1455 = vmatprep.subr.bf16.mxu0 %v1584_v33  ;;  %1469 = vmatprep.subr.bf16.mxu1 %v1584_v33  ;;  %v1072_v40 = vsel %vm1070_vm3, %v1586_v38, 0 }
  0x3c   : > { %1456 = vmatpush3.bf16.msra.mxu0 %v1584_v33  ;;  %1472 = vmatpush3.bf16.msra.mxu1 %v1584_v33 }
  0x3d   : > { %806 = vrot.lane.b32.xlu1 %v1560_v36, %s1632_s27  ;;  %780 = vrot.lane.b32.xlu0 %v774_v50, %s1631_s10  ;;  %v896_v36 = vrot.slane %v1579_v25, 1 }
  0x3e   : > { %1457 = vmatprep.subr.bf16.mxu0 %v1585_v34  ;;  %1470 = vmatprep.subr.bf16.mxu1 %v1585_v34 }
  0x3f   : > { %v897_v39 = vsel %vm589_vm0, %v895_v35, %v896_v36 }
  0x40   : > { %1458 = vmatpush3.bf16.msra.mxu0 %v1585_v34  ;;  %1473 = vmatpush3.bf16.msra.mxu1 %v1585_v34 }
  0x41   : > { %961 = vrot.lane.b32.xlu1 %v960_v55, %s1630_s6  ;;  %921 = vrot.lane.b32.xlu0 %v1767_v1, %s1632_s27  ;;  %v859_v1 = vrot.slane %v857_v13, 1  ;;  %s1329_s6 = sshll.u32 %s1943_s19, 5 }
  0x42   : > { %1475 = vmatprep.subr.msk.bf16.mxu0 %vm1070_vm3, %v1586_v38  ;;  %1476 = vmatprep.subr.msk.bf16.mxu1 %vm1070_vm3, %v1586_v38  ;;  %s393_s7 = sadd.s32 %s1329_s6, %s1328_s30 }
  0x43   : > { %v860_v27 = vsel %vm479_vm1, %v855_v19, %v859_v1 }
  0x44   : > { %1460 = vmatpush3.bf16.msra.mxu0 %v1072_v40  ;;  %1474 = vmatpush3.bf16.msra.mxu1 %v1072_v40 }
  0x45   : > { %861 = vrot.lane.b32.xlu1 %v848_v0, %s1633_s14  ;;  %808 = vrot.lane.b32.xlu0 %v1567_v3, %s1632_s27 }
  0x49   : > { %989 = vrot.lane.b32.xlu1 %v988_v12, %s1633_s14  ;;  %965 = vrot.lane.b32.xlu0 %v960_v55, %s1633_s14 }
  0x4d   : > { %898 = vrot.lane.b32.xlu1 %v894_v23, %s1634_s15  ;;  %863 = vrot.lane.b32.xlu0 %v860_v27, %s1633_s14 }
  0x51   : > { %1014 = vrot.lane.b32.xlu1 %v1009_v29, %s1634_s15  ;;  %1010 = vrot.lane.b32.xlu0 %v1009_v29, %s1631_s10  ;;  %s1330_s10 = sshll.u32 %s393_s7, 3 }
  0x52   : > { %s395_s13 = scalar_lea.vmem %s1930_s5, %s1330_s10 }
  0x55   : > { %1029 = vrot.lane.b32.xlu1 %v1028_v37, %s1634_s15  ;;  %900 = vrot.lane.b32.xlu0 %v897_v39, %s1634_s15 }
  0x8b   : > { %v646_v41 = vpop.permute.xlu1 %645  ;;  %v642_v42 = vpop.permute.xlu0 %641 }
  0x8f   : > { %v644_v43 = vpop.permute.xlu0 %643  ;;  %v607_v44 = vpop.permute.xlu1 %606 }
  0x93   : > { %v609_v45 = vpop.permute.xlu1 %608  ;;  %v603_v46 = vpop.permute.xlu0 %602 }
  0x97   : > { %v605_v47 = vpop.permute.xlu0 %604  ;;  %v531_v48 = vpop.permute.xlu1 %530 }
  0x98   : > { %542 = vst.msk [vmem:[#allocation2 + $0x8] sm:$0xff] %vm540_vm4, %v531_v48 }
  0x99   : > { %616 = vst.msk [vmem:[#allocation2 + $0x8] sm:$0xff] %vm614_vm5, %v605_v47 }
  0x9a   : > { %652 = vst.msk [vmem:[#allocation2 + $0x8] sm:$0xff] %vm650_vm6, %v644_v43 }
  0x9b   : > { %v535_v49 = vpop.permute.xlu1 %534  ;;  %v529_v50 = vpop.permute.xlu0 %528 }
  0x9c   : > { %544 = vst.msk [vmem:[#allocation2 + $0x18] sm:$0xff] %vm540_vm4, %v535_v49  ;;  %541 = vst.msk [vmem:[#allocation2] sm:$0xff] %vm540_vm4, %v529_v50 }
  0x9d   : > { %618 = vst.msk [vmem:[#allocation2 + $0x18] sm:$0xff] %vm614_vm5, %v609_v45  ;;  %615 = vst.msk [vmem:[#allocation2] sm:$0xff] %vm614_vm5, %v603_v46 }
  0x9e   : > { %651 = vst.msk [vmem:[#allocation2] sm:$0xff] %vm650_vm6, %v642_v42 }
  0x9f   : > { %v724_v51 = vpop.permute.xlu1 %723  ;;  %v533_v52 = vpop.permute.xlu0 %532 }
  0xa0   : > { %733 = vst.msk [vmem:[#allocation2] sm:$0xff] %vm732_vm7, %v724_v51 }
  0xa1   : > { %543 = vst.msk [vmem:[#allocation2 + $0x10] sm:$0xff] %vm540_vm4, %v533_v52 }
  0xa2   : > { %617 = vst.msk [vmem:[#allocation2 + $0x10] sm:$0xff] %vm614_vm5, %v607_v44 }
  0xa3   : > { %v917_v53 = vpop.permute.xlu1 %916  ;;  %653 = vst.msk [vmem:[#allocation2 + $0x10] sm:$0xff] %vm650_vm6, %v646_v41  ;;  %v728_v54 = vpop.permute.xlu0 %727 }
  0xa4   : > { %920 = vst.msk [vmem:[#allocation2 + $0x18] sm:$0xff] %vm650_vm6, %v917_v53 }
  0xa5   : > { %735 = vst.msk [vmem:[#allocation2 + $0x10] sm:$0xff] %vm732_vm7, %v728_v54 }
  0xa7   : > { %v779_v55 = vpop.permute.xlu1 %778  ;;  %v726_v56 = vpop.permute.xlu0 %725 }
  0xa8   : > { %788 = vst.msk [vmem:[#allocation2] sm:$0xff] %vm787_vm8, %v779_v55 }
  0xa9   : > { %734 = vst.msk [vmem:[#allocation2 + $0x8] sm:$0xff] %vm732_vm7, %v726_v56 }
  0xab   : > { %v932_v57 = vpop.permute.xlu1 %931  ;;  %v783_v58 = vpop.permute.xlu0 %782 }
  0xac   : > { %934 = vst.msk [vmem:[#allocation2 + $0x18] sm:$0xff] %vm812_vm9, %v932_v57 }
  0xad   : > { %790 = vst.msk [vmem:[#allocation2 + $0x10] sm:$0xff] %vm787_vm8, %v783_v58 }
  0xaf   : > { %v807_v59 = vpop.permute.xlu1 %806  ;;  %v781_v60 = vpop.permute.xlu0 %780 }
  0xb0   : > { %813 = vst.msk [vmem:[#allocation2] sm:$0xff] %vm812_vm9, %v807_v59 }
  0xb1   : > { %789 = vst.msk [vmem:[#allocation2 + $0x8] sm:$0xff] %vm787_vm8, %v781_v60 }
  0xb3   : > { %v962_v61 = vpop.permute.xlu1 %961  ;;  %v922_v62 = vpop.permute.xlu0 %921 }
  0xb4   : > { %964 = vst.msk [vmem:[#allocation2 + $0x18] sm:$0xff] %vm732_vm7, %v962_v61 }
  0xb5   : > { %925 = vst.msk [vmem:[#allocation2 + $0x10] sm:$0xff] %vm812_vm9, %v922_v62 }
  0xb7   : > { %v862_v63 = vpop.permute.xlu1 %861  ;;  %v809_v0 = vpop.permute.xlu0 %808 }
  0xb8   : > { %868 = vst.msk [vmem:[#allocation2] sm:$0xff] %vm867_vm10, %v862_v63 }
  0xb9   : > { %814 = vst.msk [vmem:[#allocation2 + $0x8] sm:$0xff] %vm812_vm9, %v809_v0 }
  0xbb   : > { %v990_v2 = vpop.permute.xlu1 %989  ;;  %v966_v3 = vpop.permute.xlu0 %965 }
  0xbc   : > { %992 = vst.msk [vmem:[#allocation2 + $0x18] sm:$0xff] %vm867_vm10, %v990_v2  ;;  %968 = vst.msk [vmem:[#allocation2 + $0x10] sm:$0xff] %vm867_vm10, %v966_v3 }
  0xbf   : > { %v899_v4 = vpop.permute.xlu1 %898  ;;  %v864_v5 = vpop.permute.xlu0 %863 }
  0xc0   : > { %905 = vst.msk [vmem:[#allocation2] sm:$0xff] %vm904_vm11, %v899_v4 }
  0xc1   : > { %869 = vst.msk [vmem:[#allocation2 + $0x8] sm:$0xff] %vm867_vm10, %v864_v5 }
  0xc3   : > { %v1015_v6 = vpop.permute.xlu1 %1014  ;;  %v1011_v7 = vpop.permute.xlu0 %1010 }
  0xc4   : > { %1017 = vst.msk [vmem:[#allocation2 + $0x10] sm:$0xff] %vm904_vm11, %v1015_v6 }
  0xc5   : > { %1013 = vst.msk [vmem:[#allocation2 + $0x18] sm:$0xff] %vm787_vm8, %v1011_v7 }
  0xc7   : > { %v1030_v8 = vpop.permute.xlu1 %1029  ;;  %v1033_v9 = vld [vmem:[#allocation2] sm:$0xff]  ;;  %v901_v10 = vpop.permute.xlu0 %900 }
  0xc8   : > { %1032 = vst.msk [vmem:[#allocation2 + $0x18] sm:$0xff] %vm904_vm11, %v1030_v8  ;;  %1461 = vmatprep.mubr.msk.bf16.mxu0 %vm1057_vm12, %v1033_v9  ;;  %906 = vst.msk [vmem:[#allocation2 + $0x8] sm:$0xff] %vm904_vm11, %v901_v10 }
  0xcb   : > { %v1035_v11 = vld [vmem:[#allocation2 + $0x10] sm:$0xff] }
  0xcc   : > { %1465 = vmatprep.mubr.msk.bf16.mxu1 %vm1057_vm12, %v1035_v11 }
  0xcf   : > { %v1036_v12 = vld [vmem:[#allocation2 + $0x18] sm:$0xff]  ;;  %v1034_v13 = vld [vmem:[#allocation2 + $0x8] sm:$0xff] }
  0xd0   : > { %1466 = vmatmul.mubr.msk.bf16.vlgmr.msra.gmra.mrb[0].mxu1 %vm1057_vm12, %v1036_v12  ;;  %1462 = vmatmul.mubr.msk.bf16.vlgmr.msra.gmra.mrb[0].mxu0 %vm1057_vm12, %v1034_v13 }
 0x1a3   : > { %v1467_v15 = vpop.f32.mrb[0].mxu1  ;;  %v1463_v19 = vpop.f32.mrb[0].mxu0 }
 0x1a4   : > { %v1152_v16 = vadd.f32 %v1467_v15, %v1433_v14  ;;  %v1124_v1 = vpop.f32.mrb[1].mxu1  ;;  %v1148_v23 = vadd.f32 %v1463_v19, %v1433_v14  ;;  %v1108_v24 = vpop.f32.mrb[1].mxu0 }
 0x1a5   : > { %v1150_v17 = vadd.f32 %v1433_v14, %v1124_v1  ;;  %v1468_v18 = vpop.f32.mrb[2].mxu1  ;;  %v1146_v27 = vadd.f32 %v1433_v14, %v1108_v24  ;;  %v1464_v28 = vpop.f32.mrb[2].mxu0 }
 0x1a6   : > { %v1160_v20 = vmax.f32 %v1152_v16, 0.0  ;;  %v1153_v21 = vadd.f32 %v1468_v18, %v1433_v14  ;;  %v1127_v22 = vpop.f32.mrb[3].mxu1  ;;  %v1156_v30 = vmax.f32 %v1148_v23, 0.0  ;;  %v1149_v31 = vadd.f32 %v1464_v28, %v1433_v14  ;;  %v1111_v32 = vpop.f32.mrb[3].mxu0 }
 0x1a7   : > { %v1158_v25 = vmax.f32 %v1150_v17, 0.0  ;;  %v1151_v26 = vadd.f32 %v1433_v14, %v1127_v22  ;;  %v1154_v34 = vmax.f32 %v1146_v27, 0.0  ;;  %v1147_v35 = vadd.f32 %v1433_v14, %v1111_v32 }
 0x1a8   : > { %1169 = vst.msk [vmem:[%s395_s13 + $0x30] sm:$0xff] %vm1162_vm13, %v1160_v20  ;;  %v1161_v29 = vmax.f32 %v1153_v21, 0.0  ;;  %1165 = vst.msk [vmem:[%s395_s13 + $0x10] sm:$0xff] %vm1162_vm13, %v1156_v30  ;;  %v1157_v36 = vmax.f32 %v1149_v31, 0.0 }
 0x1a9   : > { %1167 = vst.msk [vmem:[%s395_s13 + $0x20] sm:$0xff] %vm1162_vm13, %v1158_v25  ;;  %v1159_v33 = vmax.f32 %v1151_v26, 0.0  ;;  %1163 = vst.msk [vmem:[%s395_s13] sm:$0xff] %vm1162_vm13, %v1154_v34  ;;  %v1155_v37 = vmax.f32 %v1147_v35, 0.0 }
 0x1aa   : > { %1170 = vst.msk [vmem:[%s395_s13 + $0x38] sm:$0xff] %vm1162_vm13, %v1161_v29  ;;  %1166 = vst.msk [vmem:[%s395_s13 + $0x18] sm:$0xff] %vm1162_vm13, %v1157_v36 }
 0x1ab   : > { %1168 = vst.msk [vmem:[%s395_s13 + $0x28] sm:$0xff] %vm1162_vm13, %v1159_v33  ;;  %1164 = vst.msk [vmem:[%s395_s13 + $0x8] sm:$0xff] %vm1162_vm13, %v1155_v37 }
 0x1ac PF: > { %s15_s22 = sadd.s32 1, %s1625_s22   ;;  %s1932_s18 = smov %s1617_s20 }
 0x1ad   : > { %p12_p10 = scmp.ge.s32.totalorder %s15_s22, 10   ;;  %s1933_s19 = smov %s1621_s21 }
 0x1ae   : > { %s1934_s20 = smov %s1937_s23  ;;  %s1935_s21 = smov %s1941_s24 }
 0x1af   :  { %14 = sbr.rel (!%p12_p10) target bundleno = 3 (0x3), region = 80 }

</bundles_post_ra>
